<compile_context>
chip_gen: v5e
topology: v5e:2x2
jax: 0.10.0
libtpu: 0.0.40
codegen_flags: <defaults>
</compile_context>

<pallas_src>
import functools

import jax
import jax.numpy as jnp
from jax.experimental import pallas as pl
from jax.experimental.pallas import tpu as pltpu


def _grad_kernel_hw(x_ref, o_ref, *, H, W):
    """3-D path: x_ref / o_ref are (nb, H, W) with W lane-dense (W % 128 == 0)."""
    x = x_ref[...].astype(jnp.float32)

    # pltpu.roll(x, s, axis)[i] == x[i - s]; shifts kept non-negative.
    down = pltpu.roll(x, (H - 1) % H, 1)    # down[:, i, :]  = x[:, i+1, :] (wraps at i=H-1)
    up = pltpu.roll(x, 1 % H, 1)            # up[:, i, :]    = x[:, i-1, :] (wraps at i=0)
    right = pltpu.roll(x, (W - 1) % W, 2)   # right[:, :, j] = x[:, :, j+1]
    left = pltpu.roll(x, 1 % W, 2)          # left[:, :, j]  = x[:, :, j-1]

    # Boundary masks (reproduce the padding=1 zero padding).  Built at image shape
    # (amortized over the nb batched images) and applied multiplicatively.
    row = jax.lax.broadcasted_iota(jnp.int32, (1, H, W), 1)
    col = jax.lax.broadcasted_iota(jnp.int32, (1, H, W), 2)
    md = (row < H - 1).astype(jnp.float32)   # last row has no x[i+1]
    mu = (row >= 1).astype(jnp.float32)      # first row has no x[i-1]
    mr = (col < W - 1).astype(jnp.float32)   # last col has no x[:,j+1]
    ml = (col >= 1).astype(jnp.float32)      # first col has no x[:,j-1]

    gv = down * md - up * mu
    gh = right * mr - left * ml
    o_ref[...] = jnp.sqrt(gv * gv + gh * gh + 1e-6).astype(o_ref.dtype)


def _grad_kernel_flat(x_ref, colmask_ref, o_ref, *, H, W):
    """Flat path: x_ref / o_ref are (nb, H*W) (one flattened image per lane-dense row).

    colmask_ref is (2, H*W) float32: row 0 = right-tap mask (j != W-1),
                                     row 1 = left-tap mask  (j != 0).
    """
    HW = H * W
    x = x_ref[...].astype(jnp.float32)

    down = pltpu.roll(x, (HW - W) % HW, 1)   # x[k + W]  -> row i+1 (wrap masked below)
    up = pltpu.roll(x, W % HW, 1)            # x[k - W]  -> row i-1
    right = pltpu.roll(x, (HW - 1) % HW, 1)  # x[k + 1]  -> col j+1
    left = pltpu.roll(x, 1 % HW, 1)          # x[k - 1]  -> col j-1

    # Row masks only need the flat index itself (no %W) -> cheap per-step build at
    # (1, HW); column masks (which would need %W per element) come precomputed.
    k = jax.lax.broadcasted_iota(jnp.int32, (1, HW), 1)
    md = (k < (H - 1) * W).astype(jnp.float32)
    mu = (k >= W).astype(jnp.float32)
    mr = colmask_ref[0:1, :]
    ml = colmask_ref[1:2, :]

    gv = down * md - up * mu
    gh = right * mr - left * ml
    o_ref[...] = jnp.sqrt(gv * gv + gh * gh + 1e-6).astype(o_ref.dtype)


def _pick_batch_block(N, bytes_per_image, target_bytes=8 << 20):
    """Images per grid step: big enough to amortize the ~0.35us/step pipeline overhead
    (single-TC v5e/v6e), small enough to keep the double-buffered set VMEM-friendly."""
    nb = int(max(1, min(N, target_bytes // max(bytes_per_image, 1))))
    while N % nb:
        nb -= 1
    return nb


def get_gradient_nopadding(x):
    """x: (N, C, H, W). Returns sqrt(gv^2 + gh^2 + 1e-6) of channel 0, shape (N,1,H,W)."""
    N, C, H, W = x.shape
    HW = H * W
    isz = x.dtype.itemsize

    nb = _pick_batch_block(N, HW * isz)
    block_bytes = nb * HW * isz
    mask_bytes = 0 if W % 128 == 0 else 2 * HW * 4

    cost = pl.CostEstimate(
        flops=11 * N * HW,
        transcendentals=N * HW,
        bytes_accessed=2 * N * HW * isz + mask_bytes,
    )
    # Double-buffered input + output blocks (+ the small mask input on the flat path).
    vmem_needed = 4 * block_bytes + 2 * mask_bytes + (2 << 20)
    vmem_limit = int(min(64 << 20, max(8 << 20, vmem_needed)))
    compiler_params = pltpu.CompilerParams(
        dimension_semantics=("parallel",),
        vmem_limit_bytes=vmem_limit,
    )

    if W % 128 == 0:
        # Lane-dense rows without flattening: vertical taps are single sublane
        # rotates, no side inputs, no reshapes at all.
        out = pl.pallas_call(
            functools.partial(_grad_kernel_hw, H=H, W=W),
            out_shape=jax.ShapeDtypeStruct((N, 1, H, W), x.dtype),
            grid_spec=pl.GridSpec(
                grid=(N // nb,),
                in_specs=[
                    # (nb, C=1@ch0, H, W) block; channel dim squeezed from the view.
                    pl.BlockSpec((nb, None, H, W), lambda n: (n, 0, 0, 0)),
                ],
                out_specs=pl.BlockSpec((nb, None, H, W), lambda n: (n, 0, 0, 0)),
            ),
            compiler_params=compiler_params,
            cost_estimate=cost,
        )(x)
        return out

    # Awkward W: flatten each image to one lane-dense H*W row (free contiguous
    # reshape); channel selection stays in the BlockSpec.
    x4 = x.reshape(N, C, 1, HW)
    col = jnp.arange(HW, dtype=jnp.int32) % W
    col_masks = jnp.stack([(col != W - 1), (col != 0)]).astype(jnp.float32)  # (2, HW)

    out = pl.pallas_call(
        functools.partial(_grad_kernel_flat, H=H, W=W),
        out_shape=jax.ShapeDtypeStruct((N, 1, HW), x.dtype),
        grid_spec=pl.GridSpec(
            grid=(N // nb,),
            in_specs=[
                pl.BlockSpec((nb, None, None, HW), lambda n: (n, 0, 0, 0)),
                # Constant index_map: the (2, HW) mask block is DMA'd once, not
                # re-fetched on subsequent grid steps.
                pl.BlockSpec((2, HW), lambda n: (0, 0)),
            ],
            out_specs=pl.BlockSpec((nb, None, HW), lambda n: (n, 0, 0)),
        ),
        compiler_params=compiler_params,
        cost_estimate=cost,
    )(x4, col_masks)
    return out.reshape(N, 1, H, W)


def _reference(x):
    """Pure-JAX reference mirroring F.conv2d(x[:,0:1], w, padding=1) + sqrt(...)."""
    x0 = x[:, 0].astype(jnp.float32)
    xp = jnp.pad(x0, ((0, 0), (1, 1), (1, 1)))
    gv = xp[:, 2:, 1:-1] - xp[:, :-2, 1:-1]  # x[i+1, j] - x[i-1, j]
    gh = xp[:, 1:-1, 2:] - xp[:, 1:-1, :-2]  # x[i, j+1] - x[i, j-1]
    return jnp.sqrt(gv * gv + gh * gh + 1e-6)[:, None].astype(x.dtype)


if __name__ == "__main__":
    # Primary shapes implied by the module (NCHW); W=16 exercises the flat path.
    x1 = jax.random.normal(jax.random.PRNGKey(0), (2, 4, 16, 16), dtype=jnp.float32)
    out1 = jax.block_until_ready(get_gradient_nopadding(x1))
    assert out1.shape == (2, 1, 16, 16)
    assert jnp.allclose(out1, _reference(x1), atol=1e-5, rtol=1e-5)

    # Lane-aligned width exercises the 3-D (sublane-roll) path.
    x2 = jax.random.normal(jax.random.PRNGKey(0), (2, 3, 16, 128), dtype=jnp.float32)
    out2 = jax.block_until_ready(get_gradient_nopadding(x2))
    assert out2.shape == (2, 1, 16, 128)
    assert jnp.allclose(out2, _reference(x2), atol=1e-5, rtol=1e-5)

    print("KERNEL_OK")
</pallas_src>

<mosaic_0001>
module attributes {stable_mosaic.version = 11 : i64} {
  func.func @_grad_kernel_flat(%arg0: i32, %arg1: memref<2x1x1x256xf32, #tpu.memory_space<vmem>>, %arg2: memref<2x256xf32, #tpu.memory_space<vmem>>, %arg3: memref<2x1x256xf32, #tpu.memory_space<vmem>>) attributes {dimension_semantics = [#tpu.dimension_semantics<parallel>], iteration_bounds = array<i64: 1>, scalar_prefetch = 0 : i64, scratch_operands = 0 : i64, tpu.core_type = #tpu.core_type<tc>, window_params = [{transform_indices = @transform_0, window_bounds = array<i64: 2, 1, 1, 256>}, {pipeline_mode = #tpu.pipeline_mode<synchronous>, transform_indices = @transform_1, window_bounds = array<i64: 2, 256>}, {transform_indices = @transform_2, window_bounds = array<i64: 2, 1, 256>}]} {
    %c0 = arith.constant 0 : index
    %c0_0 = arith.constant 0 : index
    %c0_1 = arith.constant 0 : index
    %c0_2 = arith.constant 0 : index
    %0 = vector.load %arg1[%c0, %c0_0, %c0_1, %c0_2] : memref<2x1x1x256xf32, #tpu.memory_space<vmem>>, vector<2x1x1x256xf32>
    %1 = vector.shape_cast %0 : vector<2x1x1x256xf32> to vector<2x256xf32>
    %c240_i32 = arith.constant 240 : i32
    %2 = tpu.dynamic_rotate %1 by %c240_i32 dim 1 : vector<2x256xf32>, i32 -> vector<2x256xf32>
    %c16_i32 = arith.constant 16 : i32
    %3 = tpu.dynamic_rotate %1 by %c16_i32 dim 1 : vector<2x256xf32>, i32 -> vector<2x256xf32>
    %c255_i32 = arith.constant 255 : i32
    %4 = tpu.dynamic_rotate %1 by %c255_i32 dim 1 : vector<2x256xf32>, i32 -> vector<2x256xf32>
    %c1_i32 = arith.constant 1 : i32
    %5 = tpu.dynamic_rotate %1 by %c1_i32 dim 1 : vector<2x256xf32>, i32 -> vector<2x256xf32>
    %6 = tpu.iota {dimensions = array<i32: 1>} : vector<1x256xi32>
    %c240_i32_3 = arith.constant 240 : i32
    %7 = vector.broadcast %c240_i32_3 : i32 to vector<1x256xi32>
    %8 = arith.cmpi slt, %6, %7 : vector<1x256xi32>
    %9 = arith.extui %8 : vector<1x256xi1> to vector<1x256xi32>
    %10 = arith.sitofp %9 : vector<1x256xi32> to vector<1x256xf32>
    %c16_i32_4 = arith.constant 16 : i32
    %11 = vector.broadcast %c16_i32_4 : i32 to vector<1x256xi32>
    %12 = arith.cmpi sge, %6, %11 : vector<1x256xi32>
    %13 = arith.extui %12 : vector<1x256xi1> to vector<1x256xi32>
    %14 = arith.sitofp %13 : vector<1x256xi32> to vector<1x256xf32>
    %c0_5 = arith.constant 0 : index
    %c0_6 = arith.constant 0 : index
    %15 = vector.load %arg2[%c0_5, %c0_6] : memref<2x256xf32, #tpu.memory_space<vmem>>, vector<1x256xf32>
    %c1 = arith.constant 1 : index
    %c0_7 = arith.constant 0 : index
    %16 = vector.load %arg2[%c1, %c0_7] : memref<2x256xf32, #tpu.memory_space<vmem>>, vector<1x256xf32>
    %17 = vector.broadcast %10 : vector<1x256xf32> to vector<2x256xf32>
    %18 = arith.mulf %2, %17 : vector<2x256xf32>
    %19 = vector.broadcast %14 : vector<1x256xf32> to vector<2x256xf32>
    %20 = arith.mulf %3, %19 : vector<2x256xf32>
    %21 = arith.subf %18, %20 : vector<2x256xf32>
    %22 = vector.broadcast %15 : vector<1x256xf32> to vector<2x256xf32>
    %23 = arith.mulf %4, %22 : vector<2x256xf32>
    %24 = vector.broadcast %16 : vector<1x256xf32> to vector<2x256xf32>
    %25 = arith.mulf %5, %24 : vector<2x256xf32>
    %26 = arith.subf %23, %25 : vector<2x256xf32>
    %27 = arith.mulf %21, %21 : vector<2x256xf32>
    %28 = arith.mulf %26, %26 : vector<2x256xf32>
    %29 = arith.addf %27, %28 : vector<2x256xf32>
    %cst = arith.constant 9.99999997E-7 : f32
    %30 = vector.broadcast %cst : f32 to vector<2x256xf32>
    %31 = arith.addf %29, %30 : vector<2x256xf32>
    %32 = math.sqrt %31 : vector<2x256xf32>
    %c0_8 = arith.constant 0 : index
    %c0_9 = arith.constant 0 : index
    %c0_10 = arith.constant 0 : index
    %33 = vector.load %arg3[%c0_8, %c0_9, %c0_10] : memref<2x1x256xf32, #tpu.memory_space<vmem>>, vector<2x1x256xf32>
    %34 = vector.shape_cast %33 : vector<2x1x256xf32> to vector<2x256xf32>
    %35 = vector.shape_cast %32 : vector<2x256xf32> to vector<2x1x256xf32>
    tpu.vector_store %arg3[%c0_8, %c0_9, %c0_10], %35 {strides = array<i32>} : memref<2x1x256xf32, #tpu.memory_space<vmem>>, vector<2x1x256xf32>,
    return
  }
  func.func @transform_0(%arg0: i32) -> (i32, i32, i32, i32) {
    %c0_i32 = arith.constant 0 : i32
    %c0_i32_0 = arith.constant 0 : i32
    %c0_i32_1 = arith.constant 0 : i32
    %c0_i32_2 = arith.constant 0 : i32
    return %arg0, %c0_i32, %c0_i32_0, %c0_i32_1 : i32, i32, i32, i32
  }
  func.func @transform_1(%arg0: i32) -> (i32, i32) {
    %c0_i32 = arith.constant 0 : i32
    %c0_i32_0 = arith.constant 0 : i32
    %c0_i32_1 = arith.constant 0 : i32
    return %c0_i32, %c0_i32_0 : i32, i32
  }
  func.func @transform_2(%arg0: i32) -> (i32, i32, i32) {
    %c0_i32 = arith.constant 0 : i32
    %c0_i32_0 = arith.constant 0 : i32
    %c0_i32_1 = arith.constant 0 : i32
    return %arg0, %c0_i32, %c0_i32_0 : i32, i32, i32
  }
}

</mosaic_0001>

<bundles_post_ra>
// kernel: tpu_custom_call.1
= control target key start
LH: loop header
LB: loop body
LE: loop exit
PB: predicated region body
PF: predicated region fallthrough
CT: control target
= control target key end

     0   :  { %7 = vsyncpa [#allocation3], 0  ;;  %s351_s0 = inlined_call_operand.hbm [shape: f32[2,4,1,256], index: 0, kind: input, shape index: {}]   ;;  %s352_s1 = inlined_call_operand.hbm [shape: f32[2,256], index: 1, kind: input, shape index: {}]   ;;  %s353_s2 = inlined_call_operand.hbm [shape: f32[2,1,256], index: 2, kind: output, shape index: {}]  }
   0x1   :  { %8 = vsyncpa [#allocation6], 0 }
   0x2   :  { %9 = vsyncpa [#allocation4], 0  ;;  %s14_s11 = sshll.u32 %s351_s0, 4  ;;  %s305_s12 = smov [#allocation2]   ;;  %s15_s11 = int_to_ptr.hbm [resolvable:$true] %s14_s11 }
   0x3   :  { %s16_s13 = sshll.u32 %s305_s12, 4  ;;  %s306_s14 = smov 128   ;;  %s17_s13 = int_to_ptr.vmem [resolvable:$true] %s16_s13 }
   0x4   :  { %s307_s15 = smov 32   ;;  %s308_s16 = smov 2  }
   0x5   :  { %22 = dma.hbm_to_vmem [thread:$0]  %s15_s11, 64, %s17_s13, [#allocation3], %s306_s14, %s307_s15, %s308_s16  }
   0x6   :  { %s28_s19 = sshll.u32 %s352_s1, 4  ;;  %s309_s20 = smov [#allocation5]   ;;  %s29_s19 = int_to_ptr.hbm [resolvable:$true] %s28_s19 }
   0x7   :  { %s30_s21 = sshll.u32 %s309_s20, 4  ;;  %s31_s21 = int_to_ptr.vmem [resolvable:$true] %s30_s21 }
   0x8   :  { %33 = dma.hbm_to_vmem [thread:$0]  %s29_s19, 64, %s31_s21, [#allocation6]  }
   0x9   :  { %299 = dma.done.wait [#allocation3], 64  }
   0xa   :  { %300 = vsyncadd [#allocation3], 4294967232 }
   0xb   :  { %301 = dma.done.wait [#allocation6], 64  }
   0xc   :  { %302 = vsyncadd [#allocation6], 4294967232  ;;  %v42_v0 = vld [vmem:[#allocation2] sm:$0x3]  ;;  %v43_v1 = vld [vmem:[#allocation2 + $0x2] sm:$0x3]  ;;  %v57_v12 = vlaneseq }
   0xd   :  { %46 = vst [vmem:[#allocation1] ss:$9 sm:$0xff] %v42_v0  ;;  %s310_s0 = smov 112   ;;  %s311_s1 = smov 16   ;;  %v314_v29 = vmov 0.0   ;;  %vm177_vm8 = vcmask 1040384  }
   0xe   :  { %48 = vst [vmem:[#allocation1 + $0x1] ss:$9 sm:$0xff] %v43_v1  ;;  %s312_s22 = smov 127   ;;  %s313_s23 = smov 1   ;;  %v58_v14 = vand.u32 127, %v57_v12  ;;  %vm179_vm10 = vcmask 1041409  }
   0xf   :  { %v117_v15 = vld [vmem:[#allocation5] ss:$2 sm:$0x3]  ;;  %v119_v18 = vld [vmem:[#allocation5 + $0x1] ss:$2 sm:$0x3] }
  0x10   :  { %v104_v16 = vadd.s32 128, %v58_v14  ;;  %vm87_vm0 = vcmp.lt.s32.totalorder %v58_v14, 127  ;;  %vm101_vm1 = vcmp.lt.s32.totalorder %v58_v14, 1  ;;  %v128_v20 = vperm.slane %v117_v15, 1  ;;  %s315_s24 = smov [#allocation7]   ;;  %s196_s28 = sshll.u32 %s353_s2, 4  ;;  %s197_s28 = int_to_ptr.hbm [resolvable:$true] %s196_s28 }
  0x11   :  { %vm59_vm2 = vcmp.lt.s32.totalorder %v58_v14, 112  ;;  %v135_v23 = vperm.slane %v119_v18, 1  ;;  %v127_v24 = vperm.slane %v117_v15, 0  ;;  %v134_v27 = vperm.slane %v119_v18, 0  ;;  %s194_s25 = sshll.u32 %s315_s24, 4  ;;  %s195_s25 = int_to_ptr.vmem [resolvable:$true] %s194_s25 }
  0x12   :  { %vm106_vm3 = vcmp.lt.s32.totalorder %v104_v16, 240  ;;  %vm111_vm4 = vcmp.ge.s32.totalorder %v58_v14, 16  ;;  %vm73_vm5 = vcmp.lt.s32.totalorder %v58_v14, 16  ;;  %vm186_vm12 = vcmp.lt.s32.totalorder %v57_v12, 256 }
  0x13   :  { %v210_v30 = vsel %vm106_vm3, 1.0, %v314_v29  ;;  %v211_v36 = vsel %vm111_vm4, 1.0, %v314_v29 }
  0x15   :  { %v49_v2 = vld [vmem:[#allocation1] sm:$0xff]  ;;  %v50_v3 = vld [vmem:[#allocation1 + $0x9] sm:$0xff] }
  0x16   :  { %53 = vrot.lane.b32.xlu0 %v49_v2, %s310_s0  ;;  %62 = vst [vmem:[#allocation1] ss:$9 sm:$0xff] %v42_v0 }
  0x17   :  { %64 = vst [vmem:[#allocation1 + $0x1] ss:$9 sm:$0xff] %v43_v1 }
  0x1e   :  { %55 = vrot.lane.b32.xlu0 %v50_v3, %s310_s0  ;;  %v65_v4 = vld [vmem:[#allocation1] sm:$0xff]  ;;  %v66_v5 = vld [vmem:[#allocation1 + $0x9] sm:$0xff] }
  0x1f   :  { %76 = vst [vmem:[#allocation1] ss:$9 sm:$0xff] %v42_v0 }
  0x20   :  { %78 = vst [vmem:[#allocation1 + $0x1] ss:$9 sm:$0xff] %v43_v1 }
  0x26   :  { %69 = vrot.lane.b32.xlu0 %v65_v4, %s311_s1 }
  0x27   :  { %v79_v6 = vld [vmem:[#allocation1] sm:$0xff]  ;;  %v80_v7 = vld [vmem:[#allocation1 + $0x9] sm:$0xff] }
  0x28   :  { %83 = vrot.lane.b32.xlu1 %v79_v6, %s312_s22  ;;  %90 = vst [vmem:[#allocation1] ss:$9 sm:$0xff] %v42_v0 }
  0x29   :  { %92 = vst [vmem:[#allocation1 + $0x1] ss:$9 sm:$0xff] %v43_v1 }
  0x30   :  { %85 = vrot.lane.b32.xlu1 %v80_v7, %s312_s22  ;;  %v93_v8 = vld [vmem:[#allocation1] sm:$0xff]  ;;  %v94_v9 = vld [vmem:[#allocation1 + $0x9] sm:$0xff] }
  0x31   :  { %97 = vrot.lane.b32.xlu2 %v93_v8, %s313_s23 }
  0x38   :  { %71 = vrot.lane.b32.xlu1 %v66_v5, %s311_s1 }
  0x39   :  { %99 = vrot.lane.b32.xlu2 %v94_v9, %s313_s23 }
  0x88   :  { %v54_v10 = vpop.permute.xlu0 %53 }
  0x8b   :  { %v98_v11 = vpop.permute.xlu2 %97 }
  0x90   :  { %v56_v17 = vpop.permute.xlu0 %55 }
  0x91   :  { %v61_v31 = vsel %vm59_vm2, %v56_v17, %v54_v10  ;;  %v60_v46 = vsel %vm59_vm2, %v54_v10, %v56_v17 }
  0x92   :  { %v121_v37 = vmul.f32 %v210_v30, %v61_v31 }
  0x93   :  { %v100_v19 = vpop.permute.xlu2 %99 }
  0x94   :  { %v102_v25 = vsel %vm101_vm1, %v98_v11, %v100_v19  ;;  %v103_v32 = vsel %vm101_vm1, %v100_v19, %v98_v11 }
  0x95   :  { %v139_v33 = vmul.f32 %v135_v23, %v102_v25  ;;  %v138_v38 = vmul.f32 %v134_v27, %v103_v32 }
  0x98   :  { %v70_v35 = vpop.permute.xlu0 %69 }
  0x9a   :  { %v84_v13 = vpop.permute.xlu1 %83 }
  0xa2   :  { %v86_v21 = vpop.permute.xlu1 %85 }
  0xa3   :  { %v89_v22 = vsel %vm87_vm0, %v86_v21, %v84_v13  ;;  %v88_v26 = vsel %vm87_vm0, %v84_v13, %v86_v21 }
  0xa4   :  { %v132_v28 = vmul.f32 %v128_v20, %v89_v22  ;;  %v131_v34 = vmul.f32 %v127_v24, %v88_v26 }
  0xa6   :  { %v141_v39 = vsub.f32 %v132_v28, %v139_v33  ;;  %v140_v43 = vsub.f32 %v131_v34, %v138_v38 }
  0xa8   :  { %v145_v47 = vmul.f32 %v141_v39, %v141_v39  ;;  %v144_v50 = vmul.f32 %v140_v43, %v140_v43 }
  0xaa   :  { %v72_v40 = vpop.permute.xlu1 %71 }
  0xab   :  { %v74_v41 = vsel %vm73_vm5, %v70_v35, %v72_v40  ;;  %v75_v42 = vsel %vm73_vm5, %v72_v40, %v70_v35 }
  0xac   :  { %v122_v44 = vmul.f32 %v211_v36, %v75_v42  ;;  %v125_v45 = vsub.f32 %v121_v37, %v74_v41 }
  0xae   :  { %v124_v48 = vsub.f32 %v60_v46, %v122_v44  ;;  %v143_v49 = vmul.f32 %v125_v45, %v125_v45 }
  0xb0   :  { %v142_v51 = vmul.f32 %v124_v48, %v124_v48  ;;  %v147_v52 = vadd.f32 %v145_v47, %v143_v49 }
  0xb2   :  { %v146_v53 = vadd.f32 %v144_v50, %v142_v51  ;;  %v149_v54 = vadd.f32 1e-06, %v147_v52 }
  0xb4   :  { %v148_v55 = vadd.f32 1e-06, %v146_v53  ;;  %223 = vrsqrt.f32 %v149_v54  ;;  %vm169_vm6 = vcmp.eq.f32.partialorder %v149_v54, inf  ;;  %v172_v5 = vand.u32 2147483648, %v149_v54 }
  0xb5   :  { %vm171_vm7 = vcmp.eq.f32.partialorder %v149_v54, 0.0 }
  0xb6   :  { %225 = vrsqrt.f32 %v148_v55  ;;  %vm157_vm9 = vcmp.eq.f32.partialorder %v148_v55, inf  ;;  %v160_v8 = vand.u32 2147483648, %v148_v55  ;;  %vm159_vm11 = vcmp.eq.f32.partialorder %v148_v55, 0.0 }
  0xba   :  { %v224_v56 = vpop.eup %223 }
  0xbb   :  { %v163_v57 = vmul.f32 %v224_v56, %v149_v54 }
  0xbc   :  { %v226_v58 = vpop.eup %225 }
  0xbd   :  { %v151_v59 = vmul.f32 %v226_v58, %v148_v55  ;;  %v164_v60 = vmul.f32 %v224_v56, %v163_v57 }
  0xbf   :  { %v152_v61 = vmul.f32 %v226_v58, %v151_v59  ;;  %v165_v62 = vmul.f32 0.5, %v164_v60 }
  0xc1   :  { %v153_v63 = vmul.f32 0.5, %v152_v61  ;;  %v166_v0 = vsub.f32 1.5, %v165_v62 }
  0xc3   :  { %v154_v1 = vsub.f32 1.5, %v153_v63  ;;  %v167_v2 = vmul.f32 %v224_v56, %v166_v0 }
  0xc5   :  { %v155_v3 = vmul.f32 %v226_v58, %v154_v1  ;;  %v168_v4 = vmul.f32 %v167_v2, %v149_v54 }
  0xc7   :  { %v156_v6 = vmul.f32 %v155_v3, %v148_v55  ;;  %v170_v7 = vsel %vm169_vm6, %v149_v54, %v168_v4 }
  0xc8   :  { %v173_v9 = vsel %vm171_vm7, %v172_v5, %v170_v7 }
  0xc9   :  { %v158_v10 = vsel %vm157_vm9, %v148_v55, %v156_v6  ;;  %v176_v11 = vrot.slane %v173_v9, 7 }
  0xca   :  { %v161_v13 = vsel %vm159_vm11, %v160_v8, %v158_v10 }
  0xcb   :  { %v178_v14 = vsel %vm177_vm8, %v161_v13, %v176_v11  ;;  %v180_v15 = vsel %vm179_vm10, %v161_v13, %v176_v11 }
  0xcc   :  { %v181_v16 = vrot.slane %v180_v15, 1  ;;  %188 = vst.msk [vmem:[#allocation7] sm:$0x3] %vm186_vm12, %v178_v14 }
  0xce   :  { %189 = vst.msk [vmem:[#allocation7 + $0x2] sm:$0x3] %vm186_vm12, %v181_v16 }
  0xcf   :  { %202 = dma.vmem_to_hbm [thread:$0]  %s195_s25, 64, %s197_s28, [#allocation4], %s307_s15, %s307_s15, %s308_s16  }
  0xd0   :  { %303 = dma.done.wait [#allocation4], 64  }
  0xd1   :  { %304 = vsyncadd [#allocation4], 4294967232 }
  0xd2   :  { %207 = vsyncpa [#allocation3], 1 }
  0xd3   :  { %208 = vsyncpa [#allocation6], 1 }
  0xd4   :  { %209 = vsyncpa [#allocation4], 1 }

</bundles_post_ra>
